<compile_context>
chip_gen: v7x
topology: tpu7x:2x2x1
jax: 0.10.0
libtpu: 0.0.40
codegen_flags: <defaults>
</compile_context>

<pallas_src>
import functools

import jax
import jax.numpy as jnp
from jax.experimental import pallas as pl
from jax.experimental.pallas import tpu as pltpu


def _nll_kernel(pred_ref, cmp_ref, out_ref, acc_ref, *, inv_n):
    i = pl.program_id(1)

    @pl.when(i == 0)
    def _init():
        acc_ref[...] = jnp.zeros_like(acc_ref)

    # cmp[g, l] == l  exactly at the flat position of pred[row, target[row]].
    lane = jax.lax.broadcasted_iota(jnp.int32, cmp_ref.shape, 1)
    hit = cmp_ref[...] == lane
    vals = jnp.where(hit, pred_ref[...].astype(jnp.float32), jnp.float32(0.0))
    acc_ref[...] += jnp.sum(vals, axis=0, keepdims=True)        # (1, 128)

    @pl.when(i == pl.num_programs(1) - 1)
    def _finalize():
        val = -jnp.sum(acc_ref[...]) * jnp.float32(inv_n)
        # Lane-dense (8,128) block, full unmasked store.
        out_ref[...] = jnp.zeros(out_ref.shape, jnp.float32) + val


def _round_up(a, b):
    return -(-a // b) * b


def nll_loss_pallas(pred, target, *, max_tile_rows=4096, num_shards=2):
    """Mean NLL loss of log-probabilities `pred` (N, C) at integer `target` (N,)."""
    n, c = pred.shape
    flat = n * c

    # ---- static tiling plan (all Python ints) --------------------------------
    m_min = -(-flat // 128)                                  # packed rows needed
    per_shard = -(-m_min // num_shards)
    tile_rows = max(8, min(max_tile_rows, _round_up(per_shard, 8)))
    steps = -(-per_shard // tile_rows)
    m_pad = num_shards * steps * tile_rows
    flat_pad = m_pad * 128

    # ---- lane-dense repack (wrapper-side layout plumbing) ---------------------
    pred_flat = pred.reshape(flat)                           # keep input dtype
    row_ids = jnp.arange(n, dtype=jnp.int32)
    sel_flat = row_ids * c + target.astype(jnp.int32)        # flat idx of the pick
    pos = jnp.arange(flat, dtype=jnp.int32)
    cmp_flat = jnp.repeat(sel_flat, c) - (pos // 128) * 128  # == lane only at pick
    # NOTE: out-of-range targets silently contribute 0 (PyTorch would raise).

    if flat_pad != flat:
        # Padding positions: pred = 0, cmp = -1 (never matches a lane in [0,128)).
        pred_flat = jnp.pad(pred_flat, (0, flat_pad - flat))
        cmp_flat = jnp.pad(cmp_flat, (0, flat_pad - flat), constant_values=-1)

    pred_packed = pred_flat.reshape(m_pad, 128)
    cmp_packed = cmp_flat.reshape(m_pad, 128)

    cost = pl.CostEstimate(
        flops=3 * flat_pad,
        transcendentals=0,
        bytes_accessed=(flat_pad * pred.dtype.itemsize       # packed pred
                        + flat_pad * 4                        # packed compare map
                        + num_shards * 8 * 128 * 4),          # per-shard out block
    )

    out = pl.pallas_call(
        functools.partial(_nll_kernel, inv_n=1.0 / n),
        out_shape=jax.ShapeDtypeStruct((num_shards * 8, 128), jnp.float32),
        grid_spec=pltpu.PrefetchScalarGridSpec(
            num_scalar_prefetch=0,
            grid=(num_shards, steps),
            in_specs=[
                pl.BlockSpec((tile_rows, 128), lambda p, i: (p * steps + i, 0)),
                pl.BlockSpec((tile_rows, 128), lambda p, i: (p * steps + i, 0)),
            ],
            out_specs=pl.BlockSpec((8, 128), lambda p, i: (p, 0)),
            scratch_shapes=[pltpu.VMEM((1, 128), jnp.float32)],
        ),
        compiler_params=pltpu.CompilerParams(
            dimension_semantics=("parallel", "arbitrary"),
            vmem_limit_bytes=32 * 1024 * 1024,
        ),
        cost_estimate=cost,
    )(pred_packed, cmp_packed)

    # Each shard wrote -sum(shard)/N over its whole (8,128) block; pick one
    # element per shard and add the shards.
    return jnp.sum(out.reshape(num_shards, 8, 128)[:, 0, 0])


def get_loss(pred, target, trans_feat=None):
    """Mirrors the PyTorch module: trans_feat is accepted but unused."""
    del trans_feat
    return nll_loss_pallas(pred, target)


if __name__ == "__main__":
    key = jax.random.PRNGKey(0)
    k_logits, k_tgt = jax.random.split(key)

    # Part-seg head shapes: batch=2, n_points=128, num_part=50
    #   -> pred (256, 50) log-probs, target (256,)
    batch, n_points, num_part = 2, 128, 50
    n = batch * n_points

    logits = jax.random.normal(k_logits, (n, num_part), dtype=jnp.float32)
    pred = jax.nn.log_softmax(logits, axis=-1)          # log-probs, like the model
    target = jax.random.randint(k_tgt, (n,), 0, num_part, dtype=jnp.int32)
    trans_feat = jax.random.normal(key, (batch, 64, 64), dtype=jnp.float32)  # unused

    loss = get_loss(pred, target, trans_feat)
    loss = jax.block_until_ready(loss)

    # quiet sanity check against a pure-JAX reference
    ref = -jnp.mean(pred[jnp.arange(n), target])
    assert jnp.allclose(loss, ref, atol=1e-5, rtol=1e-5), (loss, ref)

    print("KERNEL_OK")
</pallas_src>

<mosaic_0001>
module attributes {stable_mosaic.version = 11 : i64} {
  func.func @_nll_kernel(%arg0: i32, %arg1: i32, %arg2: memref<56x128xf32, #tpu.memory_space<vmem>>, %arg3: memref<56x128xi32, #tpu.memory_space<vmem>>, %arg4: memref<8x128xf32, #tpu.memory_space<vmem>>, %arg5: memref<1x128xf32, #tpu.memory_space<vmem>>) attributes {dimension_semantics = [#tpu.dimension_semantics<parallel>, #tpu.dimension_semantics<arbitrary>], iteration_bounds = array<i64: 2, 1>, scalar_prefetch = 0 : i64, scratch_operands = 1 : i64, tpu.core_type = #tpu.core_type<tc>, window_params = [{transform_indices = @transform_0, window_bounds = array<i64: 56, 128>}, {transform_indices = @transform_1, window_bounds = array<i64: 56, 128>}, {transform_indices = @transform_2, window_bounds = array<i64: 8, 128>}]} {
    %c0_i32 = arith.constant 0 : i32
    %0 = arith.cmpi eq, %arg1, %c0_i32 : i32
    %1 = arith.extui %0 : i1 to i32
    %c0_i32_0 = arith.constant 0 : i32
    %2 = arith.cmpi ne, %1, %c0_i32_0 : i32
    scf.if %2 {
      %cst_11 = arith.constant 0.000000e+00 : f32
      %17 = vector.broadcast %cst_11 : f32 to vector<1x128xf32>
      %c0_12 = arith.constant 0 : index
      %c0_13 = arith.constant 0 : index
      %18 = vector.load %arg5[%c0_12, %c0_13] : memref<1x128xf32, #tpu.memory_space<vmem>>, vector<1x128xf32>
      tpu.vector_store %arg5[%c0_12, %c0_13], %17 {strides = array<i32>} : memref<1x128xf32, #tpu.memory_space<vmem>>, vector<1x128xf32>,
    } else {
    }
    %3 = tpu.iota {dimensions = array<i32: 1>} : vector<56x128xi32>
    %c0 = arith.constant 0 : index
    %c0_1 = arith.constant 0 : index
    %4 = vector.load %arg3[%c0, %c0_1] : memref<56x128xi32, #tpu.memory_space<vmem>>, vector<56x128xi32>
    %5 = arith.cmpi eq, %4, %3 : vector<56x128xi32>
    %c0_2 = arith.constant 0 : index
    %c0_3 = arith.constant 0 : index
    %6 = vector.load %arg2[%c0_2, %c0_3] : memref<56x128xf32, #tpu.memory_space<vmem>>, vector<56x128xf32>
    %cst = arith.constant 0.000000e+00 : f32
    %7 = vector.broadcast %cst : f32 to vector<56x128xf32>
    %8 = arith.select %5, %6, %7 : vector<56x128xi1>, vector<56x128xf32>
    %c0_4 = arith.constant 0 : index
    %c0_5 = arith.constant 0 : index
    %9 = vector.load %arg5[%c0_4, %c0_5] : memref<1x128xf32, #tpu.memory_space<vmem>>, vector<1x128xf32>
    %cst_6 = arith.constant dense<0.000000e+00> : vector<128xf32>
    %10 = vector.multi_reduction <add>, %8, %cst_6 [0] : vector<56x128xf32> to vector<128xf32>
    %11 = vector.shape_cast %10 : vector<128xf32> to vector<1x128xf32>
    %12 = arith.addf %9, %11 : vector<1x128xf32>
    %c0_7 = arith.constant 0 : index
    %c0_8 = arith.constant 0 : index
    %13 = vector.load %arg5[%c0_7, %c0_8] : memref<1x128xf32, #tpu.memory_space<vmem>>, vector<1x128xf32>
    tpu.vector_store %arg5[%c0_7, %c0_8], %12 {strides = array<i32>} : memref<1x128xf32, #tpu.memory_space<vmem>>, vector<1x128xf32>,
    %c0_i32_9 = arith.constant 0 : i32
    %14 = arith.cmpi eq, %arg1, %c0_i32_9 : i32
    %15 = arith.extui %14 : i1 to i32
    %c0_i32_10 = arith.constant 0 : i32
    %16 = arith.cmpi ne, %15, %c0_i32_10 : i32
    scf.if %16 {
      %c0_11 = arith.constant 0 : index
      %c0_12 = arith.constant 0 : index
      %17 = vector.load %arg5[%c0_11, %c0_12] : memref<1x128xf32, #tpu.memory_space<vmem>>, vector<1x128xf32>
      %18 = vector.shape_cast %17 : vector<1x128xf32> to vector<1x1x128xf32>
      %cst_13 = arith.constant dense<0.000000e+00> : vector<1xf32>
      %19 = vector.multi_reduction <add>, %18, %cst_13 [1, 2] : vector<1x1x128xf32> to vector<1xf32>
      %20 = vector.shape_cast %19 : vector<1xf32> to vector<1x1x1xf32>
      %21 = vector.extract %20[0, 0, 0] : f32 from vector<1x1x1xf32>
      %cst_14 = arith.constant 0.000000e+00 : f32
      %22 = arith.subf %cst_14, %21 : f32
      %cst_15 = arith.constant 3.906250e-03 : f32
      %23 = arith.mulf %22, %cst_15 : f32
      %cst_16 = arith.constant 0.000000e+00 : f32
      %24 = vector.broadcast %cst_16 : f32 to vector<8x128xf32>
      %25 = vector.broadcast %23 : f32 to vector<8x128xf32>
      %26 = arith.addf %24, %25 : vector<8x128xf32>
      %c0_17 = arith.constant 0 : index
      %c0_18 = arith.constant 0 : index
      %27 = vector.load %arg4[%c0_17, %c0_18] : memref<8x128xf32, #tpu.memory_space<vmem>>, vector<8x128xf32>
      tpu.vector_store %arg4[%c0_17, %c0_18], %26 {strides = array<i32>} : memref<8x128xf32, #tpu.memory_space<vmem>>, vector<8x128xf32>,
    } else {
    }
    return
  }
  func.func @transform_0(%arg0: i32, %arg1: i32) -> (i32, i32) {
    %c1_i32 = arith.constant 1 : i32
    %0 = arith.muli %arg0, %c1_i32 : i32
    %1 = arith.addi %0, %arg1 : i32
    %c0_i32 = arith.constant 0 : i32
    %c0_i32_0 = arith.constant 0 : i32
    return %1, %c0_i32 : i32, i32
  }
  func.func @transform_1(%arg0: i32, %arg1: i32) -> (i32, i32) {
    %c1_i32 = arith.constant 1 : i32
    %0 = arith.muli %arg0, %c1_i32 : i32
    %1 = arith.addi %0, %arg1 : i32
    %c0_i32 = arith.constant 0 : i32
    %c0_i32_0 = arith.constant 0 : i32
    return %1, %c0_i32 : i32, i32
  }
  func.func @transform_2(%arg0: i32, %arg1: i32) -> (i32, i32) {
    %c0_i32 = arith.constant 0 : i32
    %c0_i32_0 = arith.constant 0 : i32
    return %arg0, %c0_i32 : i32, i32
  }
}

</mosaic_0001>

<bundles_post_ra>
// kernel: tpu_custom_call.1
= control target key start
LH: loop header
LB: loop body
LE: loop exit
PB: predicated region body
PF: predicated region fallthrough
CT: control target
= control target key end

     0   :  { %7 = vsyncpa [#allocation4], 0  ;;  %s913_s0 = inlined_call_operand.hbm [shape: f32[112,128], index: 0, kind: input, shape index: {}]   ;;  %s914_s1 = inlined_call_operand.hbm [shape: s32[112,128], index: 1, kind: input, shape index: {}]   ;;  %s915_s2 = inlined_call_operand.hbm [shape: f32[16,128], index: 2, kind: output, shape index: {}]  }
   0x1   :  { %9 = vsyncpa [#allocation4 + $0x1], 0 }
   0x2   :  { %10 = vsyncpa [#allocation7], 0 }
   0x3   :  { %12 = vsyncpa [#allocation7 + $0x1], 0 }
   0x4   :  { %13 = vsyncpa [#allocation5], 0 }
   0x5   :  { %15 = vsyncpa [#allocation5 + $0x1], 0  ;;  %s669_s9 = smov 0   ;;  %s671_s10 = smov 0  }
   0x6   :  { %s673_s11 = smov 0   ;;  %s675_s12 = smov 0  }
   0x7   :  { %s677_s13 = smov 0   ;;  %s679_s14 = smov 0  }
   0x8 LB: > { %s411_s15 = sadd.s32 4294967295, %s646_s14   ;;  %s412_s16 = sadd.s32 4294967294, %s646_s14   ;;  %s646_s14 = sphi %s679_s14, %s21_s14   ;;  %s642_s13 = sphi %s677_s13, %s933_s13   ;;  %s638_s12 = sphi %s675_s12, %s932_s12   ;;  %s634_s11 = sphi %s673_s11, %s931_s11   ;;  %s630_s10 = sphi %s671_s10, %s930_s10   ;;  %s626_s9 = sphi %s669_s9, %s929_s9  }
   0x9   : > { %s33_s17 = sadd.s32 1, %s642_s13  ;;  %s42_s18 = sadd.s32 1, %s634_s11 }
   0xa   : > { %p35_p0 = scmp.ge.s32.totalorder %s33_s17, 2  ;;  %p49_p1 = scmp.ne.s32.totalorder %s634_s11, %s630_s10 }
   0xb   : > { %p50_p2 = scmp.eq.s32.totalorder %s646_s14, 0  ;;  %p55_p3 = scmp.ne.s32.totalorder %s630_s10, %s626_s9 }
   0xc   : > { %s935_s17 = smov (%p35_p0, %s33_s17), 0  ;;  %p56_p5 = scmp.eq.s32.totalorder %s411_s15, 0 }
   0xd   : > { %p710_p4 = por %p50_p2, %p49_p1  ;;  %s39_s20 = ssub.s32 %s642_s13, %s935_s17 }
   0xe   : > { %p107_p6 = scmp.eq.s32.totalorder %s411_s15, 1  ;;  %p40_p7 = scmp.eq.s32.totalorder %s39_s20, 0 }
   0xf   : > { %p716_p8 = por %p56_p5, %p55_p3  ;;  %p113_p10 = scmp.eq.s32.totalorder %s412_s16, 1 }
  0x10   : > { %p720_p9 = por %p107_p6, %p49_p1  ;;  %p447_p13 = scmp.lt.s32.totalorder %s646_s14, 2 }
  0x11   : > { %s919_s21 = scalar_select %p716_p8, 1, 0 }
  0x12   : > { %s920_s22 = scalar_select %p720_p9, 1, 0 }
  0x13   : > { %s725_s23 = scalar_select %p40_p7, %s634_s11, %s42_s18  }
  0x14   : > { %p727_p11 = por %p113_p10, %p55_p3  ;;  %s734_s25 = sand.u32 1, %s634_s11  }
  0x15   : > { %s425_s26 = smul.u32 56, %s734_s25  ;;  %p740_p0 = pnand %p447_p13, %p710_p4 }
  0x16   : > { %s921_s24 = scalar_select %p727_p11, 1, 0 }
  0x17   : > { %s423_s27 = smul.u32 896, %s642_s13  ;;  %s137_s4 = scalar_lea.vmem [#allocation3], %s425_s26 }
  0x18   : > { %s145_s5 = sshll.u32 %s137_s4, 4  ;;  %s134_s6 = scalar_lea.sflag [#allocation4], %s734_s25  ;;  %s753_s5 = int_to_ptr.vmem [resolvable:$true] %s145_s5 }
  0x19   : > { %s749_s3 = scalar_lea.hbm %s913_s0, %s423_s27  ;;  %p502_p3 = pneg %p740_p0 }
  0x1a   : > { %s500_s7 = scalar_lea.hbm %s749_s3, 896  ;;  %s505_s16 = scalar_lea.hbm %s913_s0, 1792 }
  0x1b   : > { %p501_p2 = scmp.ne.s32.totalorder %s749_s3, %s500_s7  ;;  %p506_p6 = scmp.lt.u32.totalorder %s749_s3, %s913_s0 }
  0x1c   : > { %p507_p7 = scmp.lt.u32.totalorder %s505_s16, %s500_s7  ;;  %p509_p13 = scmp.lt.u32.totalorder %s500_s7, %s749_s3 }
  0x1d   : > { %p503_p4 = pnand %p502_p3, %p501_p2 }
  0x1e   : > { %p508_p10 = por %p507_p7, %p506_p6 }
  0x1f   : > { %p504_p5 = pneg %p503_p4 }
  0x20   : > { %p510_p12 = por %p509_p13, %p508_p10 }
  0x22   : > { %p511_p1 = pnand %p510_p12, %p504_p5 }
  0x24   : > { %514 = shalt.err (!%p511_p1)
}
  0x25   : > { %s515_s20 = scalar_lea.vmem %s753_s5, 896  ;;  %s648_s29 = smov [#allocation3]  }
  0x26   : > { %p516_p2 = scmp.ne.s32.totalorder %s753_s5, %s515_s20  ;;  %s520_s30 = sshll.u32 %s648_s29, 4  ;;  %s521_s30 = int_to_ptr.vmem [resolvable:$false] %s520_s30 }
  0x27   : > { %s522_s4 = scalar_lea.vmem %s521_s30, 1792  ;;  %p523_p9 = scmp.lt.s32.totalorder %s753_s5, %s521_s30 }
  0x28   : > { %p518_p4 = pnand %p516_p2, %p502_p3  ;;  %p524_p6 = scmp.lt.s32.totalorder %s522_s4, %s515_s20 }
  0x2a   : > { %p519_p11 = pneg %p518_p4  ;;  %p525_p7 = por %p524_p6, %p523_p9 }
  0x2c   : > { %p526_p10 = pnand %p525_p7, %p519_p11 }
  0x2e   : > { %529 = shalt.err (!%p526_p10)
}
  0x2f   : > { %s649_s7 = smov 128   ;;  %s650_s8 = smov 8  }
  0x30   : > { %439 = dma.hbm_to_vmem [thread:$0]  (!%p740_p0), %s749_s3, 896, %s753_s5, %s134_s6, %s649_s7, %s649_s7, %s650_s8  }
  0x31   : > { %p175_p9 = scmp.lt.s32.totalorder %s646_s14, 3  ;;  %s793_s18 = scalar_lea.hbm %s914_s1, %s423_s27 }
  0x32   : > { %p923_p11 = scmp.ge.s32.totalorder %s646_s14, 1  ;;  %s159_s20 = scalar_lea.vmem [#allocation6], %s425_s26 }
  0x33   : > { %s167_s29 = sshll.u32 %s159_s20, 4  ;;  %s156_s3 = scalar_lea.sflag [#allocation7], %s734_s25  ;;  %s803_s29 = int_to_ptr.vmem [resolvable:$true] %s167_s29 }
  0x34   : > { %p797_p12 = pnand %p923_p11, %p175_p9  ;;  %s530_s5 = scalar_lea.hbm %s793_s18, 896 }
  0x35   : > { %p531_p1 = scmp.ne.s32.totalorder %s793_s18, %s530_s5  ;;  %s535_s30 = scalar_lea.hbm %s914_s1, 1792 }
  0x36   : > { %p536_p2 = scmp.lt.u32.totalorder %s793_s18, %s914_s1  ;;  %p537_p4 = scmp.lt.u32.totalorder %s535_s30, %s530_s5 }
  0x37   : > { %p533_p5 = pnand %p531_p1, %p502_p3  ;;  %p539_p7 = scmp.lt.u32.totalorder %s530_s5, %s793_s18 }
  0x38   : > { %p538_p6 = por %p537_p4, %p536_p2 }
  0x39   : > { %p534_p13 = pneg %p533_p5 }
  0x3a   : > { %p540_p10 = por %p539_p7, %p538_p6 }
  0x3c   : > { %p541_p9 = pnand %p540_p10, %p534_p13 }
  0x3e   : > { %544 = shalt.err (!%p541_p9)
}
  0x3f   : > { %s545_s26 = scalar_lea.vmem %s803_s29, 896  ;;  %s651_s16 = smov [#allocation6]  }
  0x40   : > { %p546_p11 = scmp.ne.s32.totalorder %s803_s29, %s545_s26  ;;  %s550_s20 = sshll.u32 %s651_s16, 4  ;;  %s551_s20 = int_to_ptr.vmem [resolvable:$false] %s550_s20 }
  0x41   : > { %s552_s27 = scalar_lea.vmem %s551_s20, 1792  ;;  %p553_p8 = scmp.lt.s32.totalorder %s803_s29, %s551_s20 }
  0x42   : > { %p548_p1 = pnand %p546_p11, %p502_p3  ;;  %p554_p2 = scmp.lt.s32.totalorder %s552_s27, %s545_s26 }
  0x44   : > { %p549_p5 = pneg %p548_p1  ;;  %p555_p4 = por %p554_p2, %p553_p8 }
  0x46   : > { %p556_p6 = pnand %p555_p4, %p549_p5 }
  0x48   : > { %559 = shalt.err (!%p556_p6)
}
  0x49   : > { %442 = dma.hbm_to_vmem [thread:$0]  (!%p740_p0), %s793_s18, 896, %s803_s29, %s156_s3, %s649_s7, %s649_s7, %s650_s8  }
  0x4a   : > { %179 = sbr.rel (%p797_p12) target bundleno = 348 (0x15c), region = 28  ;;  %s837_s5 = sand.u32 (!%p797_p12), 1, %s630_s10  }
  0x4b   : > { %s427_s6 = smul.u32 (!%p797_p12), 56, %s837_s5  ;;  %s182_s30 = scalar_lea.sflag (!%p797_p12), [#allocation4], %s837_s5 }
  0x4c   : > { %p925_p8 = scmp.ne.s32.totalorder (!%p797_p12), %s919_s21, 0 }
  0x4d   : > { %s841_s28 = scalar_lea.vmem (!%p797_p12), [#allocation3], %s427_s6 }
  0x51   : > { %613 = dma.done.wait (%p925_p8), %s182_s30, 896  }
  0x52   : > { %615 = vsyncadd (%p925_p8), %s182_s30, 4294966400  ;;  %s191_s25 = scalar_lea.sflag [#allocation7], %s837_s5  ;;  %s194_s7 = scalar_lea.vmem [#allocation6], %s427_s6 }
  0x53   : > { %617 = dma.done.wait (%p925_p8), %s191_s25, 896  }
  0x54   : > { %619 = vsyncadd (%p925_p8), %s191_s25, 4294966400  ;;  %v229_v0 = vlaneseq  ;;  %v652_v1 = vmov 0.0   ;;  %v231_v3 = vld [vmem:[%s194_s7] sm:$0xff]  ;;  %v232_v4 = vld [vmem:[%s194_s7 + $0x8] sm:$0xff]  ;;  %vm278_vm7 = vcmask 1040384   ;;  %s418_s21 = sshll.u32 %s837_s5, 3 }
  0x55   : > { %228 = vst [vmem:[#allocation2] sm:$0x1] %v652_v1  ;;  %v233_v5 = vld [vmem:[%s194_s7 + $0x10] sm:$0xff]  ;;  %v234_v6 = vld [vmem:[%s194_s7 + $0x18] sm:$0xff]  ;;  %v235_v7 = vld [vmem:[%s194_s7 + $0x20] sm:$0xff]  ;;  %s420_s18 = sshll.u32 %s638_s12, 7 }
  0x56   : > { %v230_v2 = vand.u32 127, %v229_v0  ;;  %v245_v8 = vld [vmem:[%s841_s28] sm:$0xff]  ;;  %v246_v9 = vld [vmem:[%s841_s28 + $0x8] sm:$0xff]  ;;  %v236_v10 = vld [vmem:[%s194_s7 + $0x28] sm:$0xff]  ;;  %s219_s29 = scalar_lea.vmem [#allocation8], %s418_s21  ;;  %s864_s16 = scalar_lea.hbm %s915_s2, %s420_s18 }
  0x57   : > { %v247_v11 = vld [vmem:[%s841_s28 + $0x10] sm:$0xff]  ;;  %v248_v12 = vld [vmem:[%s841_s28 + $0x18] sm:$0xff]  ;;  %v249_v15 = vld [vmem:[%s841_s28 + $0x20] sm:$0xff]  ;;  %s308_s3 = sshll.u32 %s219_s29, 4  ;;  %s295_s20 = scalar_lea.sflag [#allocation5], %s837_s5  ;;  %s866_s3 = int_to_ptr.vmem [resolvable:$true] %s308_s3 }
  0x58   : > { %vm238_vm0 = vcmp.eq.s32.totalorder %v231_v3, %v230_v2  ;;  %vm239_vm1 = vcmp.eq.s32.totalorder %v232_v4, %v230_v2  ;;  %vm240_vm2 = vcmp.eq.s32.totalorder %v233_v5, %v230_v2  ;;  %vm241_vm3 = vcmp.eq.s32.totalorder %v234_v6, %v230_v2  ;;  %v237_v18 = vld [vmem:[%s194_s7 + $0x30] sm:$0xff]  ;;  %v250_v20 = vld [vmem:[%s841_s28 + $0x28] sm:$0xff]  ;;  %v251_v23 = vld [vmem:[%s841_s28 + $0x30] sm:$0xff]  ;;  %s560_s27 = scalar_lea.vmem %s866_s3, 128  ;;  %p926_p3 = scmp.ne.s32.totalorder %s920_s22, 0 }
  0x59   : > { %v252_v13 = vsel %vm238_vm0, %v245_v8, 0.0  ;;  %v253_v14 = vsel %vm239_vm1, %v246_v9, 0.0  ;;  %vm242_vm4 = vcmp.eq.s32.totalorder %v235_v7, %v230_v2  ;;  %v254_v16 = vsel %vm240_vm2, %v247_v11, 0.0  ;;  %p561_p0 = scmp.ne.s32.totalorder %s866_s3, %s560_s27  ;;  %s653_s12 = smov [#allocation8]  }
  0x5a   : > { %v260_v17 = vadd.f32 %v253_v14, %v252_v13  ;;  %v255_v19 = vsel %vm241_vm3, %v248_v12, 0.0  ;;  %vm243_vm5 = vcmp.eq.s32.totalorder %v236_v10, %v230_v2  ;;  %v256_v22 = vsel %vm242_vm4, %v249_v15, 0.0  ;;  %s564_s6 = sshll.u32 %s653_s12, 4  ;;  %s565_s6 = int_to_ptr.vmem [resolvable:$false] %s564_s6 }
  0x5b   : > { %vm244_vm6 = vcmp.eq.s32.totalorder %v237_v18, %v230_v2  ;;  %v257_v25 = vsel %vm243_vm5, %v250_v20, 0.0  ;;  %p562_p12 = pnand %p561_p0, %p926_p3  ;;  %s566_s30 = scalar_lea.vmem %s565_s6, 256 }
  0x5c   : > { %v261_v21 = vadd.f32 %v260_v17, %v254_v16  ;;  %v258_v27 = vsel %vm244_vm6, %v251_v23, 0.0  ;;  %v259_v35 = vld [vmem:[#allocation2] sm:$0x1]  ;;  %p567_p7 = scmp.lt.s32.totalorder %s866_s3, %s565_s6  ;;  %p568_p10 = scmp.lt.s32.totalorder %s566_s30, %s560_s27 }
  0x5d   : > { %p563_p13 = pneg %p562_p12 }
  0x5e   : > { %v262_v24 = vadd.f32 %v261_v21, %v255_v19  ;;  %p569_p9 = por %p568_p10, %p567_p7 }
  0x60   : > { %v263_v26 = vadd.f32 %v262_v24, %v256_v22  ;;  %p570_p11 = pnand %p569_p9, %p563_p13 }
  0x62   : > { %v264_v28 = vadd.f32 %v263_v26, %v257_v25 }
  0x64   : > { %v265_v29 = vadd.f32 %v264_v28, %v258_v27 }
  0x66   : > { %v266_v30 = vrot.slane %v265_v29, 4 }
  0x68   : > { %v267_v31 = vadd.f32 %v266_v30, %v265_v29 }
  0x6a   : > { %v268_v32 = vrot.slane %v267_v31, 2 }
  0x6c   : > { %v269_v33 = vadd.f32 %v268_v32, %v267_v31 }
  0x6e   : > { %v270_v34 = vrot.slane %v269_v33, 1 }
  0x70   : > { %v271_v36 = vadd.f32 %v270_v34, %v269_v33 }
  0x72   : > { %v272_v37 = vadd.f32 %v271_v36, %v259_v35 }
  0x74   : > { %273 = vst [vmem:[#allocation2] sm:$0x1] %v272_v37 }
  0x7b   : > { %v277_v38 = vld [vmem:[#allocation2] sm:$0x1] }
  0x7c   : > { %v279_v39 = vsel %vm278_vm7, %v277_v38, 0.0 }
  0x7d   : > { %280 = vadd.xlane.f32.xlu0 %v279_v39 }
 0x10a   : > { %v281_v40 = vpop.xlane.xlu0 %280 }
 0x10b   : > { %v282_v41 = vrot.slane %v281_v40, 4 }
 0x10d   : > { %v283_v42 = vadd.f32 %v282_v41, %v281_v40 }
 0x10f   : > { %v284_v43 = vrot.slane %v283_v42, 2 }
 0x111   : > { %v285_v44 = vadd.f32 %v284_v43, %v283_v42 }
 0x113   : > { %v286_v45 = vrot.slane %v285_v44, 1 }
 0x115   : > { %v287_v46 = vadd.f32 %v286_v45, %v285_v44 }
 0x117   : > { %428 = vpush %v287_v46 }
 0x148   : > { %s429_s8 = spop %428 }
 0x149   : > { %s289_s19 = ssub.f32 0.0, %s429_s8 }
 0x14b   : > { %s290_s4 = smul.f32 0.00390625, %s289_s19 }
 0x14d   : > { %v291_v47 = vstv %s290_s4 }
 0x14e   : > { %293 = vst [vmem:[%s219_s29] sm:$0xff] %v291_v47 }
 0x14f   : > { %573 = shalt.err (!%p570_p11)
}
 0x150   : > { %s574_s5 = scalar_lea.hbm %s864_s16, 128  ;;  %s578_s7 = scalar_lea.hbm %s915_s2, 256 }
 0x151   : > { %p575_p1 = scmp.ne.s32.totalorder %s864_s16, %s574_s5  ;;  %p579_p4 = scmp.lt.u32.totalorder %s864_s16, %s915_s2 }
 0x152   : > { %p580_p6 = scmp.lt.u32.totalorder %s578_s7, %s574_s5  ;;  %p582_p0 = scmp.lt.u32.totalorder %s574_s5, %s864_s16 }
 0x153   : > { %p576_p5 = pnand %p575_p1, %p926_p3 }
 0x154   : > { %p581_p8 = por %p580_p6, %p579_p4 }
 0x155   : > { %p577_p2 = pneg %p576_p5 }
 0x156   : > { %p583_p12 = por %p582_p0, %p581_p8 }
 0x158   : > { %p584_p13 = pnand %p583_p12, %p577_p2 }
 0x15a   : > { %587 = shalt.err (!%p584_p13)
}
 0x15b   : > { %434 = dma.vmem_to_hbm [thread:$0]  (%p926_p3), %s866_s3, 128, %s864_s16, %s295_s20  }
 0x15c PF: > { %s320_s18 = sand.u32 1, %s626_s9   ;;  %p927_p7 = scmp.ne.s32.totalorder %s921_s24, 0 }
 0x15d   : > { %p928_p10 = scmp.ge.s32.totalorder %s646_s14, 2  ;;  %s321_s19 = scalar_lea.sflag [#allocation5], %s320_s18 }
 0x15f   : > { %p444_p9 = pnand %p928_p10, %p927_p7 }
 0x161   : > { %621 = dma.done.wait (!%p444_p9), %s321_s19, 128  }
 0x162   : > { %623 = vsyncadd (!%p444_p9), %s321_s19, 4294967168  ;;  %s21_s14 = sadd.s32 1, %s646_s14   ;;  %s929_s9 = smov %s630_s10 }
 0x163   : > { %p18_p11 = scmp.ge.s32.totalorder %s21_s14, 4   ;;  %s930_s10 = smov %s634_s11 }
 0x164   : > { %s931_s11 = smov %s725_s23  ;;  %s932_s12 = smov %s642_s13 }
 0x165   : > { %s933_s13 = smov %s935_s17  ;;  %20 = sbr.rel (!%p18_p11) target bundleno = 8 (0x8), region = 94 }
 0x16c   :  { %326 = vsyncpa [#allocation4], 1 }
 0x16d   :  { %328 = vsyncpa [#allocation4 + $0x1], 1 }
 0x16e   :  { %329 = vsyncpa [#allocation7], 1 }
 0x16f   :  { %331 = vsyncpa [#allocation7 + $0x1], 1 }
 0x170   :  { %332 = vsyncpa [#allocation5], 1 }
 0x171   :  { %334 = vsyncpa [#allocation5 + $0x1], 1 }

</bundles_post_ra>
